<compile_context>
chip_gen: v6e
topology: v6e:2x2x1
jax: 0.10.0
libtpu: 0.0.40
codegen_flags: <defaults>
</compile_context>

<pallas_src>
import functools
import math

import jax
import jax.numpy as jnp
from jax import lax
from jax.experimental import pallas as pl
from jax.experimental.pallas import tpu as pltpu


def _tile(dim, candidates):
    """Largest candidate tile that evenly divides `dim`, else the full dim."""
    for c in candidates:
        if dim % c == 0:
            return c
    return dim


# ----------------------------------------------------------------------------
# Tiled linear:  out = x @ w + b      (w already in (K, N) layout)
# ----------------------------------------------------------------------------
def _linear_kernel(x_ref, w_ref, b_ref, o_ref, acc_ref):
    k = pl.program_id(2)

    @pl.when(k == 0)
    def _init():
        acc_ref[...] = jnp.zeros_like(acc_ref)

    # Weight is pre-transposed in the wrapper: no in-kernel .T / XLU transpose.
    acc_ref[...] += jnp.dot(x_ref[...], w_ref[...],
                            preferred_element_type=jnp.float32)

    @pl.when(k == pl.num_programs(2) - 1)
    def _finalize():
        o_ref[...] = (acc_ref[...] + b_ref[...].astype(jnp.float32)).astype(
            o_ref.dtype)


def pallas_linear(x2d, w_kn, b, out_dtype=None):
    """x2d: (M, K), w_kn: (K, N) (pre-transposed), b: (N,) -> (M, N)."""
    M, K = x2d.shape
    K2, N = w_kn.shape
    assert K == K2
    out_dtype = out_dtype or x2d.dtype

    tm = _tile(M, (512, 256, 128))
    tn = _tile(N, (256, 128))
    tk = _tile(K, (512, 256, 128))
    grid = (M // tm, N // tn, K // tk)
    itemsize = jnp.dtype(x2d.dtype).itemsize

    return pl.pallas_call(
        _linear_kernel,
        out_shape=jax.ShapeDtypeStruct((M, N), out_dtype),
        grid_spec=pltpu.PrefetchScalarGridSpec(
            num_scalar_prefetch=0,
            grid=grid,
            in_specs=[
                pl.BlockSpec((tm, tk), lambda i, j, k: (i, k)),
                pl.BlockSpec((tk, tn), lambda i, j, k: (k, j)),
                pl.BlockSpec((1, tn), lambda i, j, k: (0, j)),
            ],
            out_specs=pl.BlockSpec((tm, tn), lambda i, j, k: (i, j)),
            scratch_shapes=[pltpu.VMEM((tm, tn), jnp.float32)],
        ),
        compiler_params=pltpu.CompilerParams(
            dimension_semantics=("parallel", "parallel", "arbitrary"),
            vmem_limit_bytes=32 * 1024 * 1024,
        ),
        cost_estimate=pl.CostEstimate(
            flops=2 * M * N * K,
            transcendentals=0,
            bytes_accessed=(M * K + K * N + M * N) * itemsize,
        ),
    )(x2d, w_kn, b.reshape(1, N))


# ----------------------------------------------------------------------------
# Attention (+ fused output projection):
# one (batch, query-tile) per grid step, all heads inside the step.
# ----------------------------------------------------------------------------
def _make_attn_proj_kernel(n_head, head_dim):
    scale = 1.0 / math.sqrt(head_dim)
    inv_heads = 1.0 / n_head
    contract_last = (((1,), (1,)), ((), ()))  # q_h . k_h^T without explicit .T

    def attn_kernel(q_ref, k_ref, v_ref, wp_ref, bp_ref, y_ref, att_ref):
        q = q_ref[...]                          # (tq, C) query rows, all heads
        k = k_ref[...]                          # (T,  C)
        v = v_ref[...]                          # (T,  C)
        # Scale Q once (tq*C mults) instead of every per-head score matrix.
        qs = q * jnp.asarray(scale, q.dtype)

        y_parts = []
        att_acc = None
        for h in range(n_head):                 # static unroll over heads
            cols = slice(h * head_dim, (h + 1) * head_dim)

            # (tq, T) scores; contraction over head_dim, f32 accumulation.
            s = lax.dot_general(
                qs[:, cols], k[:, cols], dimension_numbers=contract_last,
                preferred_element_type=jnp.float32)
            s = s - jnp.max(s, axis=-1, keepdims=True)
            e = jnp.exp(s)
            denom = jnp.sum(e, axis=-1, keepdims=True)
            p = e * pl.reciprocal(denom, approx=True)   # softmax (EUP recip)

            # PV matmul in the input dtype, f32 accumulation.
            y_parts.append(
                jnp.dot(p.astype(v.dtype), v[:, cols],
                        preferred_element_type=jnp.float32))
            contrib = p * inv_heads                      # att.mean over heads
            att_acc = contrib if att_acc is None else att_acc + contrib

        # (tq, C) head concat, then fused output projection on the same tile:
        # y = (concat_h softmax(QK^T)V_h) @ Wp^T + bp   — no HBM round trip.
        y_cat = jnp.concatenate(y_parts, axis=-1).astype(wp_ref.dtype)
        y_proj = jnp.dot(y_cat, wp_ref[...], preferred_element_type=jnp.float32)
        y_proj = y_proj + bp_ref[...].astype(jnp.float32)

        # Lane-dense stores: (tq, C) and (tq, T).
        y_ref[...] = y_proj.astype(y_ref.dtype)
        att_ref[...] = att_acc.astype(att_ref.dtype)

    return attn_kernel


# ----------------------------------------------------------------------------
# Forward wrapper — reproduces FullAttention.forward(x, encoder_output=None)
# ----------------------------------------------------------------------------
def full_attention_forward(x, params, n_head):
    """Returns (y, att) with y: (B, T, C), att: (B, T, T) (mean over heads)."""
    B, T, C = x.shape
    assert C % n_head == 0
    hd = C // n_head
    dtype = x.dtype

    # Fused QKV weight, pre-transposed once to (C, 3C):
    # columns [0:C)=q, [C:2C)=k, [2C:3C)=v.
    w_qkv = jnp.concatenate([params["wq"], params["wk"], params["wv"]], axis=0).T
    b_qkv = jnp.concatenate([params["bq"], params["bk"], params["bv"]])

    qkv = pallas_linear(x.reshape(B * T, C), w_qkv, b_qkv, out_dtype=dtype)
    qkv = qkv.reshape(B, T, 3 * C)        # contiguous reshape: no data movement

    # Output-projection weight pre-transposed once to (C, C); bias as (1, C).
    wp_t = params["wp"].T.astype(dtype)
    bp = params["bp"].reshape(1, C)

    tq = _tile(T, (256, 128))
    grid = (B, T // tq)
    kernel = _make_attn_proj_kernel(n_head, hd)
    itemsize = jnp.dtype(dtype).itemsize

    y, att = pl.pallas_call(
        kernel,
        out_shape=(
            jax.ShapeDtypeStruct((B, T, C), dtype),
            jax.ShapeDtypeStruct((B, T, T), dtype),
        ),
        grid_spec=pltpu.PrefetchScalarGridSpec(
            num_scalar_prefetch=0,
            grid=grid,
            in_specs=[
                # q query-row tile, and k / v as column-blocks 1 / 2 of the
                # fused (B, T, 3C) slab -> no wrapper transposes or slices.
                pl.BlockSpec((None, tq, C), lambda b, i: (b, i, 0)),
                pl.BlockSpec((None, T, C), lambda b, i: (b, 0, 1)),
                pl.BlockSpec((None, T, C), lambda b, i: (b, 0, 2)),
                # Projection weight / bias: constant index_map -> DMA'd once.
                pl.BlockSpec((C, C), lambda b, i: (0, 0)),
                pl.BlockSpec((1, C), lambda b, i: (0, 0)),
            ],
            out_specs=[
                pl.BlockSpec((None, tq, C), lambda b, i: (b, i, 0)),
                pl.BlockSpec((None, tq, T), lambda b, i: (b, i, 0)),
            ],
        ),
        compiler_params=pltpu.CompilerParams(
            dimension_semantics=("parallel", "parallel"),
            vmem_limit_bytes=32 * 1024 * 1024,
        ),
        cost_estimate=pl.CostEstimate(
            flops=4 * B * T * T * C + 2 * B * T * C * C,
            transcendentals=B * n_head * T * T,
            bytes_accessed=(3 * B * T * C + C * C + B * T * C + B * T * T)
            * itemsize,
        ),
    )(qkv, qkv, qkv, wp_t, bp)

    # resid dropout = identity in eval mode.
    return y, att


# ----------------------------------------------------------------------------
# Reference (pure JAX) for a sanity check
# ----------------------------------------------------------------------------
def reference_forward(x, params, n_head):
    B, T, C = x.shape
    hd = C // n_head

    def lin(z, w, b):
        return z @ w.T + b

    k = lin(x, params["wk"], params["bk"]).reshape(B, T, n_head, hd).transpose(0, 2, 1, 3)
    q = lin(x, params["wq"], params["bq"]).reshape(B, T, n_head, hd).transpose(0, 2, 1, 3)
    v = lin(x, params["wv"], params["bv"]).reshape(B, T, n_head, hd).transpose(0, 2, 1, 3)
    att = jnp.einsum("bhqd,bhkd->bhqk", q, k) * (1.0 / math.sqrt(hd))
    att = jax.nn.softmax(att, axis=-1)
    y = jnp.einsum("bhqk,bhkd->bhqd", att, v)
    y = y.transpose(0, 2, 1, 3).reshape(B, T, C)
    y = lin(y, params["wp"], params["bp"])
    return y, att.mean(axis=1)


# ----------------------------------------------------------------------------
# Main
# ----------------------------------------------------------------------------
if __name__ == "__main__":
    B, T, C, n_head = 2, 8, 128, 4   # head_dim = 32

    key = jax.random.PRNGKey(0)
    keys = jax.random.split(key, 9)
    bound = 1.0 / math.sqrt(C)       # torch nn.Linear default init range

    def u(k, shape):
        return jax.random.uniform(k, shape, jnp.float32, -bound, bound)

    params = {
        "wk": u(keys[0], (C, C)), "bk": u(keys[1], (C,)),
        "wq": u(keys[2], (C, C)), "bq": u(keys[3], (C,)),
        "wv": u(keys[4], (C, C)), "bv": u(keys[5], (C,)),
        "wp": u(keys[6], (C, C)), "bp": u(keys[7], (C,)),
    }
    x = jax.random.normal(keys[8], (B, T, C), jnp.float32)

    fwd = jax.jit(functools.partial(full_attention_forward, n_head=n_head))
    y, att = fwd(x, params)
    y = jax.block_until_ready(y)
    att = jax.block_until_ready(att)

    y_ref, att_ref = reference_forward(x, params, n_head)
    # Tolerances account for approx-reciprocal softmax + f32 MXU accumulation.
    assert jnp.allclose(y, y_ref, atol=1e-2, rtol=1e-2), (
        "y mismatch", float(jnp.max(jnp.abs(y - y_ref))))
    assert jnp.allclose(att, att_ref, atol=1e-2, rtol=1e-2), (
        "att mismatch", float(jnp.max(jnp.abs(att - att_ref))))

    print("KERNEL_OK")
</pallas_src>

<mosaic_0001>
module attributes {stable_mosaic.version = 11 : i64} {
  func.func @_linear_kernel(%arg0: i32, %arg1: i32, %arg2: i32, %arg3: memref<16x128xf32, #tpu.memory_space<vmem>>, %arg4: memref<128x128xf32, #tpu.memory_space<vmem>>, %arg5: memref<1x128xf32, #tpu.memory_space<vmem>>, %arg6: memref<16x128xf32, #tpu.memory_space<vmem>>, %arg7: memref<16x128xf32, #tpu.memory_space<vmem>>) attributes {dimension_semantics = [#tpu.dimension_semantics<parallel>, #tpu.dimension_semantics<parallel>, #tpu.dimension_semantics<arbitrary>], iteration_bounds = array<i64: 1, 3, 1>, scalar_prefetch = 0 : i64, scratch_operands = 1 : i64, tpu.core_type = #tpu.core_type<tc>, window_params = [{transform_indices = @transform_0, window_bounds = array<i64: 16, 128>}, {transform_indices = @transform_1, window_bounds = array<i64: 128, 128>}, {transform_indices = @transform_2, window_bounds = array<i64: 1, 128>}, {transform_indices = @transform_3, window_bounds = array<i64: 16, 128>}]} {
    %c0_i32 = arith.constant 0 : i32
    %0 = arith.cmpi eq, %arg2, %c0_i32 : i32
    %1 = arith.extui %0 : i1 to i32
    %c0_i32_0 = arith.constant 0 : i32
    %2 = arith.cmpi ne, %1, %c0_i32_0 : i32
    scf.if %2 {
      %cst_10 = arith.constant 0.000000e+00 : f32
      %12 = vector.broadcast %cst_10 : f32 to vector<16x128xf32>
      %c0_11 = arith.constant 0 : index
      %c0_12 = arith.constant 0 : index
      %13 = vector.load %arg7[%c0_11, %c0_12] : memref<16x128xf32, #tpu.memory_space<vmem>>, vector<16x128xf32>
      tpu.vector_store %arg7[%c0_11, %c0_12], %12 {strides = array<i32>} : memref<16x128xf32, #tpu.memory_space<vmem>>, vector<16x128xf32>,
    } else {
    }
    %c0 = arith.constant 0 : index
    %c0_1 = arith.constant 0 : index
    %3 = vector.load %arg7[%c0, %c0_1] : memref<16x128xf32, #tpu.memory_space<vmem>>, vector<16x128xf32>
    %c0_2 = arith.constant 0 : index
    %c0_3 = arith.constant 0 : index
    %4 = vector.load %arg3[%c0_2, %c0_3] : memref<16x128xf32, #tpu.memory_space<vmem>>, vector<16x128xf32>
    %c0_4 = arith.constant 0 : index
    %c0_5 = arith.constant 0 : index
    %5 = vector.load %arg4[%c0_4, %c0_5] : memref<128x128xf32, #tpu.memory_space<vmem>>, vector<128x128xf32>
    %cst = arith.constant dense<0.000000e+00> : vector<16x128xf32>
    %6 = tpu.matmul %4, %5, %cst {dimension_numbers = #tpu.dot_dimension_numbers<[1], [0], [0], [1], [0, 0, 1, 1], [], []>} : vector<16x128xf32>, vector<128x128xf32>, vector<16x128xf32> -> vector<16x128xf32>
    %7 = arith.addf %3, %6 : vector<16x128xf32>
    %c0_6 = arith.constant 0 : index
    %c0_7 = arith.constant 0 : index
    %8 = vector.load %arg7[%c0_6, %c0_7] : memref<16x128xf32, #tpu.memory_space<vmem>>, vector<16x128xf32>
    tpu.vector_store %arg7[%c0_6, %c0_7], %7 {strides = array<i32>} : memref<16x128xf32, #tpu.memory_space<vmem>>, vector<16x128xf32>,
    %c0_i32_8 = arith.constant 0 : i32
    %9 = arith.cmpi eq, %arg2, %c0_i32_8 : i32
    %10 = arith.extui %9 : i1 to i32
    %c0_i32_9 = arith.constant 0 : i32
    %11 = arith.cmpi ne, %10, %c0_i32_9 : i32
    scf.if %11 {
      %c0_10 = arith.constant 0 : index
      %c0_11 = arith.constant 0 : index
      %12 = vector.load %arg7[%c0_10, %c0_11] : memref<16x128xf32, #tpu.memory_space<vmem>>, vector<16x128xf32>
      %c0_12 = arith.constant 0 : index
      %c0_13 = arith.constant 0 : index
      %13 = vector.load %arg5[%c0_12, %c0_13] : memref<1x128xf32, #tpu.memory_space<vmem>>, vector<1x128xf32>
      %14 = vector.broadcast %13 : vector<1x128xf32> to vector<16x128xf32>
      %15 = arith.addf %12, %14 : vector<16x128xf32>
      %c0_14 = arith.constant 0 : index
      %c0_15 = arith.constant 0 : index
      %16 = vector.load %arg6[%c0_14, %c0_15] : memref<16x128xf32, #tpu.memory_space<vmem>>, vector<16x128xf32>
      tpu.vector_store %arg6[%c0_14, %c0_15], %15 {strides = array<i32>} : memref<16x128xf32, #tpu.memory_space<vmem>>, vector<16x128xf32>,
    } else {
    }
    return
  }
  func.func @transform_0(%arg0: i32, %arg1: i32, %arg2: i32) -> (i32, i32) {
    %c0_i32 = arith.constant 0 : i32
    return %arg0, %arg2 : i32, i32
  }
  func.func @transform_1(%arg0: i32, %arg1: i32, %arg2: i32) -> (i32, i32) {
    %c0_i32 = arith.constant 0 : i32
    return %arg2, %arg1 : i32, i32
  }
  func.func @transform_2(%arg0: i32, %arg1: i32, %arg2: i32) -> (i32, i32) {
    %c0_i32 = arith.constant 0 : i32
    %c0_i32_0 = arith.constant 0 : i32
    return %c0_i32, %arg1 : i32, i32
  }
  func.func @transform_3(%arg0: i32, %arg1: i32, %arg2: i32) -> (i32, i32) {
    %c0_i32 = arith.constant 0 : i32
    return %arg0, %arg1 : i32, i32
  }
}

module attributes {stable_mosaic.version = 11 : i64} {
  func.func @attn_kernel(%arg0: i32, %arg1: i32, %arg2: memref<1x8x128xf32, #tpu.memory_space<vmem>>, %arg3: memref<1x8x128xf32, #tpu.memory_space<vmem>>, %arg4: memref<1x8x128xf32, #tpu.memory_space<vmem>>, %arg5: memref<128x128xf32, #tpu.memory_space<vmem>>, %arg6: memref<1x128xf32, #tpu.memory_space<vmem>>, %arg7: memref<1x8x128xf32, #tpu.memory_space<vmem>>, %arg8: memref<1x8x8xf32, #tpu.memory_space<vmem>>) attributes {dimension_semantics = [#tpu.dimension_semantics<parallel>, #tpu.dimension_semantics<parallel>], iteration_bounds = array<i64: 2, 1>, scalar_prefetch = 0 : i64, scratch_operands = 0 : i64, tpu.core_type = #tpu.core_type<tc>, window_params = [{transform_indices = @transform_0, window_bounds = array<i64: 1, 8, 128>}, {transform_indices = @transform_1, window_bounds = array<i64: 1, 8, 128>}, {transform_indices = @transform_2, window_bounds = array<i64: 1, 8, 128>}, {pipeline_mode = #tpu.pipeline_mode<synchronous>, transform_indices = @transform_3, window_bounds = array<i64: 128, 128>}, {pipeline_mode = #tpu.pipeline_mode<synchronous>, transform_indices = @transform_4, window_bounds = array<i64: 1, 128>}, {transform_indices = @transform_5, window_bounds = array<i64: 1, 8, 128>}, {transform_indices = @transform_6, window_bounds = array<i64: 1, 8, 8>}]} {
    %c0 = arith.constant 0 : index
    %c0_0 = arith.constant 0 : index
    %c0_1 = arith.constant 0 : index
    %0 = vector.load %arg2[%c0, %c0_0, %c0_1] : memref<1x8x128xf32, #tpu.memory_space<vmem>>, vector<1x8x128xf32>
    %1 = vector.shape_cast %0 : vector<1x8x128xf32> to vector<8x128xf32>
    %c0_2 = arith.constant 0 : index
    %c0_3 = arith.constant 0 : index
    %c0_4 = arith.constant 0 : index
    %2 = vector.load %arg3[%c0_2, %c0_3, %c0_4] : memref<1x8x128xf32, #tpu.memory_space<vmem>>, vector<1x8x128xf32>
    %3 = vector.shape_cast %2 : vector<1x8x128xf32> to vector<8x128xf32>
    %c0_5 = arith.constant 0 : index
    %c0_6 = arith.constant 0 : index
    %c0_7 = arith.constant 0 : index
    %4 = vector.load %arg4[%c0_5, %c0_6, %c0_7] : memref<1x8x128xf32, #tpu.memory_space<vmem>>, vector<1x8x128xf32>
    %5 = vector.shape_cast %4 : vector<1x8x128xf32> to vector<8x128xf32>
    %cst = arith.constant 0.176776692 : f32
    %6 = vector.broadcast %cst : f32 to vector<8x128xf32>
    %7 = arith.mulf %1, %6 : vector<8x128xf32>
    %8 = vector.extract_strided_slice %7 {offsets = [0, 0], sizes = [8, 32], strides = [1, 1]} : vector<8x128xf32> to vector<8x32xf32>
    %9 = vector.extract_strided_slice %3 {offsets = [0, 0], sizes = [8, 32], strides = [1, 1]} : vector<8x128xf32> to vector<8x32xf32>
    %cst_8 = arith.constant dense<0.000000e+00> : vector<8x8xf32>
    %10 = tpu.matmul %8, %9, %cst_8 {dimension_numbers = #tpu.dot_dimension_numbers<[1], [1], [0], [0], [0, 0, 1, 0], [], []>} : vector<8x32xf32>, vector<8x32xf32>, vector<8x8xf32> -> vector<8x8xf32>
    %cst_9 = arith.constant dense<0xFF800000> : vector<8xf32>
    %11 = vector.multi_reduction <maximumf>, %10, %cst_9 [1] : vector<8x8xf32> to vector<8xf32>
    %12 = vector.shape_cast %11 : vector<8xf32> to vector<8x1xf32>
    %13 = vector.broadcast %12 : vector<8x1xf32> to vector<8x8xf32>
    %14 = arith.subf %10, %13 : vector<8x8xf32>
    %15 = math.exp %14 : vector<8x8xf32>
    %cst_10 = arith.constant dense<0.000000e+00> : vector<8xf32>
    %16 = vector.multi_reduction <add>, %15, %cst_10 [1] : vector<8x8xf32> to vector<8xf32>
    %17 = vector.shape_cast %16 : vector<8xf32> to vector<8x1xf32>
    %18 = tpu.reciprocal %17 {approx = true} : vector<8x1xf32> -> vector<8x1xf32>
    %19 = vector.broadcast %18 : vector<8x1xf32> to vector<8x8xf32>
    %20 = arith.mulf %15, %19 : vector<8x8xf32>
    %21 = vector.extract_strided_slice %5 {offsets = [0, 0], sizes = [8, 32], strides = [1, 1]} : vector<8x128xf32> to vector<8x32xf32>
    %cst_11 = arith.constant dense<0.000000e+00> : vector<8x32xf32>
    %22 = tpu.matmul %20, %21, %cst_11 {dimension_numbers = #tpu.dot_dimension_numbers<[1], [0], [0], [1], [0, 0, 1, 1], [], []>} : vector<8x8xf32>, vector<8x32xf32>, vector<8x32xf32> -> vector<8x32xf32>
    %cst_12 = arith.constant 2.500000e-01 : f32
    %23 = vector.broadcast %cst_12 : f32 to vector<8x8xf32>
    %24 = arith.mulf %20, %23 : vector<8x8xf32>
    %25 = vector.extract_strided_slice %7 {offsets = [0, 32], sizes = [8, 32], strides = [1, 1]} : vector<8x128xf32> to vector<8x32xf32>
    %26 = vector.extract_strided_slice %3 {offsets = [0, 32], sizes = [8, 32], strides = [1, 1]} : vector<8x128xf32> to vector<8x32xf32>
    %cst_13 = arith.constant dense<0.000000e+00> : vector<8x8xf32>
    %27 = tpu.matmul %25, %26, %cst_13 {dimension_numbers = #tpu.dot_dimension_numbers<[1], [1], [0], [0], [0, 0, 1, 0], [], []>} : vector<8x32xf32>, vector<8x32xf32>, vector<8x8xf32> -> vector<8x8xf32>
    %cst_14 = arith.constant dense<0xFF800000> : vector<8xf32>
    %28 = vector.multi_reduction <maximumf>, %27, %cst_14 [1] : vector<8x8xf32> to vector<8xf32>
    %29 = vector.shape_cast %28 : vector<8xf32> to vector<8x1xf32>
    %30 = vector.broadcast %29 : vector<8x1xf32> to vector<8x8xf32>
    %31 = arith.subf %27, %30 : vector<8x8xf32>
    %32 = math.exp %31 : vector<8x8xf32>
    %cst_15 = arith.constant dense<0.000000e+00> : vector<8xf32>
    %33 = vector.multi_reduction <add>, %32, %cst_15 [1] : vector<8x8xf32> to vector<8xf32>
    %34 = vector.shape_cast %33 : vector<8xf32> to vector<8x1xf32>
    %35 = tpu.reciprocal %34 {approx = true} : vector<8x1xf32> -> vector<8x1xf32>
    %36 = vector.broadcast %35 : vector<8x1xf32> to vector<8x8xf32>
    %37 = arith.mulf %32, %36 : vector<8x8xf32>
    %38 = vector.extract_strided_slice %5 {offsets = [0, 32], sizes = [8, 32], strides = [1, 1]} : vector<8x128xf32> to vector<8x32xf32>
    %cst_16 = arith.constant dense<0.000000e+00> : vector<8x32xf32>
    %39 = tpu.matmul %37, %38, %cst_16 {dimension_numbers = #tpu.dot_dimension_numbers<[1], [0], [0], [1], [0, 0, 1, 1], [], []>} : vector<8x8xf32>, vector<8x32xf32>, vector<8x32xf32> -> vector<8x32xf32>
    %cst_17 = arith.constant 2.500000e-01 : f32
    %40 = vector.broadcast %cst_17 : f32 to vector<8x8xf32>
    %41 = arith.mulf %37, %40 : vector<8x8xf32>
    %42 = arith.addf %24, %41 : vector<8x8xf32>
    %43 = vector.extract_strided_slice %7 {offsets = [0, 64], sizes = [8, 32], strides = [1, 1]} : vector<8x128xf32> to vector<8x32xf32>
    %44 = vector.extract_strided_slice %3 {offsets = [0, 64], sizes = [8, 32], strides = [1, 1]} : vector<8x128xf32> to vector<8x32xf32>
    %cst_18 = arith.constant dense<0.000000e+00> : vector<8x8xf32>
    %45 = tpu.matmul %43, %44, %cst_18 {dimension_numbers = #tpu.dot_dimension_numbers<[1], [1], [0], [0], [0, 0, 1, 0], [], []>} : vector<8x32xf32>, vector<8x32xf32>, vector<8x8xf32> -> vector<8x8xf32>
    %cst_19 = arith.constant dense<0xFF800000> : vector<8xf32>
    %46 = vector.multi_reduction <maximumf>, %45, %cst_19 [1] : vector<8x8xf32> to vector<8xf32>
    %47 = vector.shape_cast %46 : vector<8xf32> to vector<8x1xf32>
    %48 = vector.broadcast %47 : vector<8x1xf32> to vector<8x8xf32>
    %49 = arith.subf %45, %48 : vector<8x8xf32>
    %50 = math.exp %49 : vector<8x8xf32>
    %cst_20 = arith.constant dense<0.000000e+00> : vector<8xf32>
    %51 = vector.multi_reduction <add>, %50, %cst_20 [1] : vector<8x8xf32> to vector<8xf32>
    %52 = vector.shape_cast %51 : vector<8xf32> to vector<8x1xf32>
    %53 = tpu.reciprocal %52 {approx = true} : vector<8x1xf32> -> vector<8x1xf32>
    %54 = vector.broadcast %53 : vector<8x1xf32> to vector<8x8xf32>
    %55 = arith.mulf %50, %54 : vector<8x8xf32>
    %56 = vector.extract_strided_slice %5 {offsets = [0, 64], sizes = [8, 32], strides = [1, 1]} : vector<8x128xf32> to vector<8x32xf32>
    %cst_21 = arith.constant dense<0.000000e+00> : vector<8x32xf32>
    %57 = tpu.matmul %55, %56, %cst_21 {dimension_numbers = #tpu.dot_dimension_numbers<[1], [0], [0], [1], [0, 0, 1, 1], [], []>} : vector<8x8xf32>, vector<8x32xf32>, vector<8x32xf32> -> vector<8x32xf32>
    %cst_22 = arith.constant 2.500000e-01 : f32
    %58 = vector.broadcast %cst_22 : f32 to vector<8x8xf32>
    %59 = arith.mulf %55, %58 : vector<8x8xf32>
    %60 = arith.addf %42, %59 : vector<8x8xf32>
    %61 = vector.extract_strided_slice %7 {offsets = [0, 96], sizes = [8, 32], strides = [1, 1]} : vector<8x128xf32> to vector<8x32xf32>
    %62 = vector.extract_strided_slice %3 {offsets = [0, 96], sizes = [8, 32], strides = [1, 1]} : vector<8x128xf32> to vector<8x32xf32>
    %cst_23 = arith.constant dense<0.000000e+00> : vector<8x8xf32>
    %63 = tpu.matmul %61, %62, %cst_23 {dimension_numbers = #tpu.dot_dimension_numbers<[1], [1], [0], [0], [0, 0, 1, 0], [], []>} : vector<8x32xf32>, vector<8x32xf32>, vector<8x8xf32> -> vector<8x8xf32>
    %cst_24 = arith.constant dense<0xFF800000> : vector<8xf32>
    %64 = vector.multi_reduction <maximumf>, %63, %cst_24 [1] : vector<8x8xf32> to vector<8xf32>
    %65 = vector.shape_cast %64 : vector<8xf32> to vector<8x1xf32>
    %66 = vector.broadcast %65 : vector<8x1xf32> to vector<8x8xf32>
    %67 = arith.subf %63, %66 : vector<8x8xf32>
    %68 = math.exp %67 : vector<8x8xf32>
    %cst_25 = arith.constant dense<0.000000e+00> : vector<8xf32>
    %69 = vector.multi_reduction <add>, %68, %cst_25 [1] : vector<8x8xf32> to vector<8xf32>
    %70 = vector.shape_cast %69 : vector<8xf32> to vector<8x1xf32>
    %71 = tpu.reciprocal %70 {approx = true} : vector<8x1xf32> -> vector<8x1xf32>
    %72 = vector.broadcast %71 : vector<8x1xf32> to vector<8x8xf32>
    %73 = arith.mulf %68, %72 : vector<8x8xf32>
    %74 = vector.extract_strided_slice %5 {offsets = [0, 96], sizes = [8, 32], strides = [1, 1]} : vector<8x128xf32> to vector<8x32xf32>
    %cst_26 = arith.constant dense<0.000000e+00> : vector<8x32xf32>
    %75 = tpu.matmul %73, %74, %cst_26 {dimension_numbers = #tpu.dot_dimension_numbers<[1], [0], [0], [1], [0, 0, 1, 1], [], []>} : vector<8x8xf32>, vector<8x32xf32>, vector<8x32xf32> -> vector<8x32xf32>
    %cst_27 = arith.constant 2.500000e-01 : f32
    %76 = vector.broadcast %cst_27 : f32 to vector<8x8xf32>
    %77 = arith.mulf %73, %76 : vector<8x8xf32>
    %78 = arith.addf %60, %77 : vector<8x8xf32>
    %79 = tpu.concatenate %22, %39, %57, %75 in 1 : vector<8x32xf32>, vector<8x32xf32>, vector<8x32xf32>, vector<8x32xf32> -> vector<8x128xf32>
    %c0_28 = arith.constant 0 : index
    %c0_29 = arith.constant 0 : index
    %80 = vector.load %arg5[%c0_28, %c0_29] : memref<128x128xf32, #tpu.memory_space<vmem>>, vector<128x128xf32>
    %cst_30 = arith.constant dense<0.000000e+00> : vector<8x128xf32>
    %81 = tpu.matmul %79, %80, %cst_30 {dimension_numbers = #tpu.dot_dimension_numbers<[1], [0], [0], [1], [0, 0, 1, 1], [], []>} : vector<8x128xf32>, vector<128x128xf32>, vector<8x128xf32> -> vector<8x128xf32>
    %c0_31 = arith.constant 0 : index
    %c0_32 = arith.constant 0 : index
    %82 = vector.load %arg6[%c0_31, %c0_32] : memref<1x128xf32, #tpu.memory_space<vmem>>, vector<1x128xf32>
    %83 = vector.broadcast %82 : vector<1x128xf32> to vector<8x128xf32>
    %84 = arith.addf %81, %83 : vector<8x128xf32>
    %c0_33 = arith.constant 0 : index
    %c0_34 = arith.constant 0 : index
    %c0_35 = arith.constant 0 : index
    %85 = vector.load %arg7[%c0_33, %c0_34, %c0_35] : memref<1x8x128xf32, #tpu.memory_space<vmem>>, vector<1x8x128xf32>
    %86 = vector.shape_cast %85 : vector<1x8x128xf32> to vector<8x128xf32>
    %87 = vector.shape_cast %84 : vector<8x128xf32> to vector<1x8x128xf32>
    tpu.vector_store %arg7[%c0_33, %c0_34, %c0_35], %87 {strides = array<i32>} : memref<1x8x128xf32, #tpu.memory_space<vmem>>, vector<1x8x128xf32>,
    %c0_36 = arith.constant 0 : index
    %c0_37 = arith.constant 0 : index
    %c0_38 = arith.constant 0 : index
    %88 = vector.load %arg8[%c0_36, %c0_37, %c0_38] : memref<1x8x8xf32, #tpu.memory_space<vmem>>, vector<1x8x8xf32>
    %89 = vector.shape_cast %88 : vector<1x8x8xf32> to vector<8x8xf32>
    %90 = vector.shape_cast %78 : vector<8x8xf32> to vector<1x8x8xf32>
    tpu.vector_store %arg8[%c0_36, %c0_37, %c0_38], %90 {strides = array<i32>} : memref<1x8x8xf32, #tpu.memory_space<vmem>>, vector<1x8x8xf32>,
    return
  }
  func.func @transform_0(%arg0: i32, %arg1: i32) -> (i32, i32, i32) {
    %c0_i32 = arith.constant 0 : i32
    %c0_i32_0 = arith.constant 0 : i32
    return %arg0, %arg1, %c0_i32 : i32, i32, i32
  }
  func.func @transform_1(%arg0: i32, %arg1: i32) -> (i32, i32, i32) {
    %c0_i32 = arith.constant 0 : i32
    %c1_i32 = arith.constant 1 : i32
    %c0_i32_0 = arith.constant 0 : i32
    return %arg0, %c0_i32, %c1_i32 : i32, i32, i32
  }
  func.func @transform_2(%arg0: i32, %arg1: i32) -> (i32, i32, i32) {
    %c0_i32 = arith.constant 0 : i32
    %c2_i32 = arith.constant 2 : i32
    %c0_i32_0 = arith.constant 0 : i32
    return %arg0, %c0_i32, %c2_i32 : i32, i32, i32
  }
  func.func @transform_3(%arg0: i32, %arg1: i32) -> (i32, i32) {
    %c0_i32 = arith.constant 0 : i32
    %c0_i32_0 = arith.constant 0 : i32
    %c0_i32_1 = arith.constant 0 : i32
    return %c0_i32, %c0_i32_0 : i32, i32
  }
  func.func @transform_4(%arg0: i32, %arg1: i32) -> (i32, i32) {
    %c0_i32 = arith.constant 0 : i32
    %c0_i32_0 = arith.constant 0 : i32
    %c0_i32_1 = arith.constant 0 : i32
    return %c0_i32, %c0_i32_0 : i32, i32
  }
  func.func @transform_5(%arg0: i32, %arg1: i32) -> (i32, i32, i32) {
    %c0_i32 = arith.constant 0 : i32
    %c0_i32_0 = arith.constant 0 : i32
    return %arg0, %arg1, %c0_i32 : i32, i32, i32
  }
  func.func @transform_6(%arg0: i32, %arg1: i32) -> (i32, i32, i32) {
    %c0_i32 = arith.constant 0 : i32
    %c0_i32_0 = arith.constant 0 : i32
    return %arg0, %arg1, %c0_i32 : i32, i32, i32
  }
}

</mosaic_0001>

<bundles_post_ra>
// kernel: full_attention_forward.2
= control target key start
LH: loop header
LB: loop body
LE: loop exit
PB: predicated region body
PF: predicated region fallthrough
CT: control target
= control target key end

     0   :  { %s772_s12 = smov 0   ;;  %s774_s13 = smov 0   ;;  %s895_s0 = inlined_call_operand.vmem [shape: f32[16,128], index: 0, kind: input, shape index: {}]   ;;  %s896_s1 = inlined_call_operand.vmem [shape: f32[128,384], index: 1, kind: input, shape index: {}]   ;;  %s897_s2 = inlined_call_operand.vmem [shape: f32[1,384], index: 2, kind: input, shape index: {}]   ;;  %s898_s3 = inlined_call_operand.vmem [shape: f32[16,384], index: 3, kind: output, shape index: {}]  }
   0x1   :  { %s776_s14 = smov 0   ;;  %s778_s15 = smov 0  }
   0x2   :  { %s780_s16 = smov 0  }
   0x3 LB: > { %s28_s17 = sadd.s32 1, %s746_s15  ;;  %s604_s18 = sadd.s32 4294967295, %s750_s16   ;;  %s750_s16 = sphi %s780_s16, %s13_s16   ;;  %s746_s15 = sphi %s778_s15, %s903_s15   ;;  %s742_s14 = sphi %s776_s14, %s902_s14   ;;  %s738_s13 = sphi %s774_s13, %s901_s13   ;;  %s734_s12 = sphi %s772_s12, %s900_s12  }
   0x4   : > { %p30_p0 = scmp.ge.s32.totalorder %s28_s17, 3  ;;  %p76_p1 = scmp.ne.s32.totalorder %s738_s13, %s734_s12 }
   0x5   : > { %p77_p2 = scmp.eq.s32.totalorder %s750_s16, 0  ;;  %p134_p4 = scmp.eq.s32.totalorder %s604_s18, 2 }
   0x6   : > { %s905_s17 = smov (%p30_p0, %s28_s17), 0  ;;  %s69_s20 = sadd.s32 1, %s738_s13 }
   0x7   : > { %p78_p3 = por %p77_p2, %p76_p1  ;;  %s65_s19 = ssub.s32 %s746_s15, %s905_s17 }
   0x8   : > { %p67_p5 = scmp.eq.s32.totalorder %s65_s19, 0  ;;  %p807_p6 = por %p134_p4, %p76_p1 }
   0x9   : > { %p608_p7 = scmp.ge.s32.totalorder %s750_s16, 3 }
   0xa   : > { %s812_s22 = scalar_select %p67_p5, %s738_s13, %s69_s20  }
   0xb   : > { %168 = sbr.rel (%p608_p7) target bundleno = 28 (0x1c), region = 20 }
  0x10   : > { %171 = sbr.rel (!%p78_p3) target bundleno = 28 (0x1c), region = 24  ;;  %s173_s23 = sand.u32 (%p78_p3), 1, %s738_s13  }
  0x11   : > { %s610_s24 = sshll.u32 (%p78_p3), %s746_s15, 3  ;;  %s609_s25 = sshll.u32 (%p78_p3), %s173_s23, 7 }
  0x12   : > { %s820_s28 = scalar_lea.vmem (%p78_p3), %s896_s1, %s610_s24  ;;  %s175_s29 = scalar_lea.vmem (%p78_p3), [#allocation3], %s609_s25 }
  0x13   : > { %v239_v0 = vld [vmem:[%s820_s28] sm:$0xff] (%p78_p3)  ;;  %v241_v1 = vld [vmem:[%s820_s28 + $0x18] sm:$0xff] (%p78_p3)  ;;  %v243_v2 = vld [vmem:[%s820_s28 + $0x30] sm:$0xff] (%p78_p3) }
  0x14   : > { %240 = vst [vmem:[%s175_s29] sm:$0xff] (%p78_p3), %v239_v0  ;;  %242 = vst [vmem:[%s175_s29 + $0x8] sm:$0xff] (%p78_p3), %v241_v1  ;;  %v245_v3 = vld [vmem:[%s820_s28 + $0x48] sm:$0xff] (%p78_p3)  ;;  %v247_v4 = vld [vmem:[%s820_s28 + $0x60] sm:$0xff] (%p78_p3) }
  0x15   : > { %244 = vst [vmem:[%s175_s29 + $0x10] sm:$0xff] %v243_v2  ;;  %v249_v5 = vld [vmem:[%s820_s28 + $0x78] sm:$0xff]  ;;  %246 = vst [vmem:[%s175_s29 + $0x18] sm:$0xff] %v245_v3  ;;  %v251_v6 = vld [vmem:[%s820_s28 + $0x90] sm:$0xff] }
  0x16   : > { %248 = vst [vmem:[%s175_s29 + $0x20] sm:$0xff] %v247_v4  ;;  %250 = vst [vmem:[%s175_s29 + $0x28] sm:$0xff] %v249_v5  ;;  %v253_v7 = vld [vmem:[%s820_s28 + $0xa8] sm:$0xff]  ;;  %v255_v8 = vld [vmem:[%s820_s28 + $0xc0] sm:$0xff] }
  0x17   : > { %252 = vst [vmem:[%s175_s29 + $0x30] sm:$0xff] %v251_v6  ;;  %254 = vst [vmem:[%s175_s29 + $0x38] sm:$0xff] %v253_v7  ;;  %v257_v9 = vld [vmem:[%s820_s28 + $0xd8] sm:$0xff]  ;;  %v259_v10 = vld [vmem:[%s820_s28 + $0xf0] sm:$0xff] }
  0x18   : > { %256 = vst [vmem:[%s175_s29 + $0x40] sm:$0xff] %v255_v8  ;;  %v261_v11 = vld [vmem:[%s820_s28 + $0x108] sm:$0xff]  ;;  %258 = vst [vmem:[%s175_s29 + $0x48] sm:$0xff] %v257_v9  ;;  %v263_v12 = vld [vmem:[%s820_s28 + $0x120] sm:$0xff] }
  0x19   : > { %260 = vst [vmem:[%s175_s29 + $0x50] sm:$0xff] %v259_v10  ;;  %262 = vst [vmem:[%s175_s29 + $0x58] sm:$0xff] %v261_v11  ;;  %v265_v13 = vld [vmem:[%s820_s28 + $0x138] sm:$0xff]  ;;  %v267_v14 = vld [vmem:[%s820_s28 + $0x150] sm:$0xff] }
  0x1a   : > { %264 = vst [vmem:[%s175_s29 + $0x60] sm:$0xff] %v263_v12  ;;  %266 = vst [vmem:[%s175_s29 + $0x68] sm:$0xff] %v265_v13  ;;  %v269_v15 = vld [vmem:[%s820_s28 + $0x168] sm:$0xff] }
  0x1b   : > { %268 = vst [vmem:[%s175_s29 + $0x70] sm:$0xff] %v267_v14  ;;  %270 = vst [vmem:[%s175_s29 + $0x78] sm:$0xff] %v269_v15 }
  0x1c PF: > { %p611_p8 = scmp.ge.s32.totalorder %s750_s16, 1  ;;  %p281_p9 = scmp.lt.s32.totalorder %s750_s16, 4 }
  0x1e   : > { %p282_p10 = pnand %p611_p8, %p281_p9 }
  0x1f   : > { %s288_s30 = sand.u32 (!%p282_p10), 1, %s734_s12   ;;  %p331_p11 = scmp.lt.s32.totalorder (!%p282_p10), %s742_s14, 2 }
  0x20   : > { %285 = sbr.rel (%p282_p10) target bundleno = 276 (0x114), region = 66  ;;  %s612_s6 = sshll.u32 (!%p282_p10), %s288_s30, 7 }
  0x21   : > { %s846_s7 = scalar_lea.vmem (!%p282_p10), [#allocation3], %s612_s6  ;;  %s613_s20 = sshll.u32 (!%p282_p10), %s288_s30, 4 }
  0x22   : > { %s320_s23 = scalar_lea.vmem (!%p282_p10), [#allocation4], %s613_s20 }
  0x25   : > { %v343_v16 = vld [vmem:[%s895_s0] sm:$0xff]  ;;  %v360_v17 = vld [vmem:[%s846_s7 + $0x78] sm:$0xff]  ;;  %v359_v18 = vld [vmem:[%s846_s7 + $0x70] sm:$0xff]  ;;  %s332_s10 = scalar_select %p331_p11, %s742_s14, 2 }
  0x26   : > { %669 = vmatprep.mubr.f32.mxu0 %v343_v16  ;;  %637 = vmatprep.subr.mxu0 %v360_v17  ;;  %v358_v19 = vld [vmem:[%s846_s7 + $0x68] sm:$0xff]  ;;  %v357_v20 = vld [vmem:[%s846_s7 + $0x60] sm:$0xff]  ;;  %v356_v21 = vld [vmem:[%s846_s7 + $0x58] sm:$0xff]  ;;  %s616_s24 = sshll.u32 (%p807_p6), %s742_s14, 3 }
  0x27   : > { %638 = vmatpush3.msra.mxu0 %v360_v17  ;;  %v355_v22 = vld [vmem:[%s846_s7 + $0x50] sm:$0xff]  ;;  %v354_v23 = vld [vmem:[%s846_s7 + $0x48] sm:$0xff]  ;;  %v353_v24 = vld [vmem:[%s846_s7 + $0x40] sm:$0xff]  ;;  %s333_s19 = scalar_lea.vmem %s897_s2, %s332_s10  ;;  %s467_s12 = scalar_lea.vmem (%p807_p6), %s898_s3, %s616_s24 }
  0x28   : > { %639 = vmatprep.subr.mxu0 %v359_v18  ;;  %v352_v25 = vld [vmem:[%s846_s7 + $0x38] sm:$0xff]  ;;  %v351_v26 = vld [vmem:[%s846_s7 + $0x30] sm:$0xff]  ;;  %v350_v27 = vld [vmem:[%s846_s7 + $0x28] sm:$0xff] }
  0x29   : > { %640 = vmatpush3.msra.mxu0 %v359_v18  ;;  %v349_v28 = vld [vmem:[%s846_s7 + $0x20] sm:$0xff]  ;;  %v348_v29 = vld [vmem:[%s846_s7 + $0x18] sm:$0xff]  ;;  %v347_v30 = vld [vmem:[%s846_s7 + $0x10] sm:$0xff] }
  0x2a   : > { %641 = vmatprep.subr.mxu0 %v358_v19  ;;  %v346_v31 = vld [vmem:[%s846_s7 + $0x8] sm:$0xff]  ;;  %v345_v32 = vld [vmem:[%s846_s7] sm:$0xff] }
  0x2b   : > { %642 = vmatpush3.msra.mxu0 %v358_v19  ;;  %v344_v33 = vld [vmem:[%s895_s0 + $0x8] sm:$0xff]  ;;  %v614_v34 = vld [vmem:[%s333_s19] ss:$0 sm:$0xff] }
  0x2c   : > { %643 = vmatprep.subr.mxu0 %v357_v20 }
  0x2d   : > { %644 = vmatpush3.msra.mxu0 %v357_v20 }
  0x2e   : > { %645 = vmatprep.subr.mxu0 %v356_v21 }
  0x2f   : > { %646 = vmatpush3.msra.mxu0 %v356_v21 }
  0x30   : > { %647 = vmatprep.subr.mxu0 %v355_v22 }
  0x31   : > { %648 = vmatpush3.msra.mxu0 %v355_v22 }
  0x32   : > { %649 = vmatprep.subr.mxu0 %v354_v23 }
  0x33   : > { %650 = vmatpush3.msra.mxu0 %v354_v23 }
  0x34   : > { %651 = vmatprep.subr.mxu0 %v353_v24 }
  0x35   : > { %652 = vmatpush3.msra.mxu0 %v353_v24 }
  0x36   : > { %653 = vmatprep.subr.mxu0 %v352_v25 }
  0x37   : > { %654 = vmatpush3.msra.mxu0 %v352_v25 }
  0x38   : > { %655 = vmatprep.subr.mxu0 %v351_v26 }
  0x39   : > { %656 = vmatpush3.msra.mxu0 %v351_v26 }
  0x3a   : > { %657 = vmatprep.subr.mxu0 %v350_v27 }
  0x3b   : > { %658 = vmatpush3.msra.mxu0 %v350_v27 }
  0x3c   : > { %659 = vmatprep.subr.mxu0 %v349_v28 }
  0x3d   : > { %660 = vmatpush3.msra.mxu0 %v349_v28 }
  0x3e   : > { %661 = vmatprep.subr.mxu0 %v348_v29 }
  0x3f   : > { %662 = vmatpush3.msra.mxu0 %v348_v29 }
  0x40   : > { %663 = vmatprep.subr.mxu0 %v347_v30 }
  0x41   : > { %664 = vmatpush3.msra.mxu0 %v347_v30 }
  0x42   : > { %665 = vmatprep.subr.mxu0 %v346_v31 }
  0x43   : > { %666 = vmatpush3.msra.mxu0 %v346_v31 }
  0x44   : > { %667 = vmatprep.subr.mxu0 %v345_v32 }
  0x45   : > { %668 = vmatpush3.msra.mxu0 %v345_v32 }
  0x46   : > { %670 = vmatmul.mubr.f32.vlgmr.msra.gmra.mxu0 %v344_v33 }
 0x106   : > { %v671_v35 = vpop.f32.mrf.mxu0 }
 0x107   : > { %v453_v36 = vadd.f32 %v671_v35, %v614_v34  ;;  %462 = sbr.rel (!%p807_p6) target bundleno = 276 (0x114), region = 82 }
 0x108   : > { %v427_v37 = vpop.f32.mrf.mxu0 }
 0x109   : > { %455 = vst [vmem:[%s320_s23 + $0x8] sm:$0xff] %v453_v36  ;;  %v452_v38 = vadd.f32 %v614_v34, %v427_v37 }
 0x10b   : > { %454 = vst [vmem:[%s320_s23] sm:$0xff] %v452_v38 }
 0x110   : > { %v500_v40 = vld [vmem:[%s320_s23 + $0x8] sm:$0xff] }
 0x111   : > { %501 = vst [vmem:[%s467_s12 + $0x18] sm:$0xff] %v500_v40 }
 0x112   : > { %v498_v39 = vld [vmem:[%s320_s23] sm:$0xff] }
 0x113   : > { %499 = vst [vmem:[%s467_s12] sm:$0xff] %v498_v39 }
 0x114 PF: > { %s13_s16 = sadd.s32 1, %s750_s16   ;;  %s900_s12 = smov %s738_s13 }
 0x115   : > { %p10_p12 = scmp.ge.s32.totalorder %s13_s16, 5   ;;  %s901_s13 = smov %s812_s22 }
 0x116   : > { %s902_s14 = smov %s746_s15  ;;  %s903_s15 = smov %s905_s17 }
 0x117   :  { %12 = sbr.rel (!%p10_p12) target bundleno = 3 (0x3), region = 157 }

// kernel: full_attention_forward.3
= control target key start
LH: loop header
LB: loop body
LE: loop exit
PB: predicated region body
PF: predicated region fallthrough
CT: control target
= control target key end

     0   :  { %12 = vsyncpa [#allocation3], 0  ;;  %s1960_s0 = inlined_call_operand.vmem [shape: f32[2,8,384], index: 0, kind: input, shape index: {}, may-alias: {0,1,2}]   ;;  %s1961_s1 = inlined_call_operand.vmem [shape: f32[2,8,384], index: 1, kind: input, shape index: {}, may-alias: {0,1,2}]   ;;  %s1962_s2 = inlined_call_operand.vmem [shape: f32[2,8,384], index: 2, kind: input, shape index: {}, may-alias: {0,1,2}]   ;;  %s1963_s3 = inlined_call_operand.vmem [shape: f32[128,128], index: 3, kind: input, shape index: {}]   ;;  %s1964_s4 = inlined_call_operand.vmem [shape: f32[1,128], index: 4, kind: input, shape index: {}]   ;;  %s1965_s5 = inlined_call_operand.hbm [shape: f32[2,8,128], index: 5, kind: output, shape index: {0}]   ;;  %s1966_s6 = inlined_call_operand.hbm [shape: f32[2,8,8], index: 6, kind: output, shape index: {1}]  }
   0x1   :  { %14 = vsyncpa [#allocation3 + $0x1], 0 }
   0x2   :  { %15 = vsyncpa [#allocation5], 0 }
   0x3   :  { %17 = vsyncpa [#allocation5 + $0x1], 0  ;;  %s1669_s21 = smov 0   ;;  %s1671_s22 = smov 0  }
   0x4   :  { %s1673_s23 = smov 0   ;;  %s1675_s24 = smov 0  }
   0x5   :  { %s1677_s25 = smov 0   ;;  %s1679_s26 = smov 0  }
   0x6 LB: > { %s1298_s27 = sadd.s32 4294967295, %s1625_s26   ;;  %s1299_s28 = sadd.s32 4294967294, %s1625_s26   ;;  %s1625_s26 = sphi %s1679_s26, %s23_s26   ;;  %s1621_s25 = sphi %s1677_s25, %s1977_s25   ;;  %s1617_s24 = sphi %s1675_s24, %s1976_s24   ;;  %s1613_s23 = sphi %s1673_s23, %s1975_s23   ;;  %s1609_s22 = sphi %s1671_s22, %s1974_s22   ;;  %s1605_s21 = sphi %s1669_s21, %s1973_s21  }
   0x7   : > { %s35_s29 = sadd.s32 1, %s1621_s25  ;;  %s166_s30 = sadd.s32 1, %s1613_s23 }
   0x8   : > { %p37_p0 = scmp.ge.s32.totalorder %s35_s29, 2  ;;  %p176_p1 = scmp.ne.s32.totalorder %s1613_s23, %s1609_s22 }
   0x9   : > { %p177_p2 = scmp.eq.s32.totalorder %s1298_s27, 1  ;;  %p182_p3 = scmp.ne.s32.totalorder %s1609_s22, %s1605_s21 }
   0xa   : > { %s1979_s29 = smov (%p37_p0, %s35_s29), 0  ;;  %p183_p5 = scmp.eq.s32.totalorder %s1299_s28, 1 }
   0xb   : > { %p1709_p4 = por %p177_p2, %p176_p1  ;;  %s161_s8 = ssub.s32 %s1621_s25, %s1979_s29 }
   0xc   : > { %p1302_p6 = scmp.ge.s32.totalorder %s1625_s26, 1  ;;  %p164_p7 = scmp.eq.s32.totalorder %s161_s8, 0 }
   0xd   : > { %p1716_p8 = por %p183_p5, %p182_p3  ;;  %p265_p9 = scmp.lt.s32.totalorder %s1625_s26, 3 }
   0xe   : > { %s1722_s10 = scalar_select %p164_p7, %s1613_s23, %s166_s30  }
   0xf   : > { %p266_p10 = pnand %p1302_p6, %p265_p9 }
  0x10   : > { %p316_p11 = scmp.lt.s32.totalorder (!%p266_p10), %s1617_s24, 1  ;;  %s1629_s19 = smov (!%p266_p10), 96  }
  0x11   : > { %269 = sbr.rel (%p266_p10) target bundleno = 2580 (0xa14), region = 40  ;;  %s1630_s30 = smov (!%p266_p10), 64  }
  0x12   : > { %s1631_s8 = smov (!%p266_p10), 32   ;;  %s1967_s16 = sshll.u32 (!%p266_p10), %s1617_s24, 7 }
  0x13   : > { %s1150_s20 = scalar_lea.hbm (!%p266_p10), %s1966_s6, %s1967_s16 }
  0x16   : > { %v1627_v0 = vmov 0.0   ;;  %vm1628_vm0 = vmmov 0   ;;  %s317_s11 = scalar_select %p316_p11, %s1617_s24, 1  ;;  %vm341_vm1 = vcmask 261120   ;;  %vm418_vm2 = vcmask 64512  }
  0x17   : > { %1362 = vmatprep.subr.mxu0 %v1627_v0  ;;  %1364 = vmatprep.mubr.msk.f32.mxu0 %vm1628_vm0, %v1627_v0  ;;  %vm1019_vm3 = vcmask 523264   ;;  %vm1021_vm4 = vcmask 785408  }
  0x18   : > { %1402 = vmatprep.subr.mxu1 %v1627_v0  ;;  %1434 = vmatprep.mubr.msk.f32.mxu1 %vm1628_vm0, %v1627_v0  ;;  %s1437_s12 = smul.u32 24, %s317_s11  ;;  %s1813_s11 = sand.u32 1, %s1609_s22  }
  0x19   : > { %s1124_s27 = scalar_lea.sflag [#allocation5], %s1813_s11 }
  0x1a   : > { %s1224_s15 = scalar_lea.vmem %s1961_s1, %s1437_s12  ;;  %s324_s18 = scalar_lea.vmem %s1960_s0, %s1437_s12 }
  0x1b   : > { %v1738_v1 = vld [vmem:[%s1224_s15 + $0x8] sm:$0xff]  ;;  %v337_v2 = vld [vmem:[%s324_s18] sm:$0xff]  ;;  %s1228_s28 = scalar_lea.vmem %s1962_s2, %s1437_s12  ;;  %s1968_s12 = sshll.u32 %s1813_s11, 3 }
  0x1c   : > { %1363 = vmatpush3.xpose.msk.msra.mxu0 %vm341_vm1, %v1738_v1  ;;  %v1742_v3 = vmul.f32 0.17677669, %v337_v2  ;;  %506 = vrot.lane.b32.xlu1 %v1738_v1, %s1629_s19  ;;  %v1758_v12 = vld [vmem:[%s1228_s28 + $0x10] sm:$0xff]  ;;  %s1819_s13 = scalar_lea.vmem [#allocation4], %s1968_s12 }
  0x1d   : > { %1367 = vmatprep.subr.mxu0 %v1627_v0 }
  0x1f   : > { %1365 = vmatmul.mubr.msk.f32.vlgmr.msra.gmra.mxu0 %vm341_vm1, %v1742_v3 }
  0x20   : > { %1369 = vmatprep.mubr.msk.f32.mxu0 %vm1628_vm0, %v1627_v0  ;;  %504 = vrot.lane.b32.xlu1 %v1742_v3, %s1629_s19 }
  0x21   : > { %1368 = vmatpush3.msra.mxu0 %v1758_v12 }
  0x22   : > { %1372 = vmatprep.subr.mxu0 %v1627_v0 }
  0x8e   : > { %v507_v14 = vpop.permute.xlu1 %506 }
  0x92   : > { %v505_v17 = vpop.permute.xlu1 %504 }
  0xdf   : > { %v414_v4 = vpop.f32.mrf.mxu0 }
  0xe0   : > { %v419_v5 = vsel %vm418_vm2, %v414_v4, -inf }
  0xe1   : > { %420 = vmax.xlane.f32.xlu0 %v419_v5  ;;  %v1366_v6 = vpop.f32.mrf.mxu0 }
 0x16a   : > { %v421_v7 = vpop.xlane.xlu0 %420 }
 0x16b   : > { %v422_v8 = vsub.f32 %v414_v4, %v421_v7 }
 0x16d   : > { %v423_v9 = vmul.f32 1.442695, %v422_v8  ;;  %v1038_v8 = vld [vmem:[%s1963_s3 + $0x78] sm:$0xff] }
 0x16e   : > { %1403 = vmatpush3.msra.mxu1 %v1038_v8 }
 0x16f   : > { %1503 = vpow2.f32 %v423_v9  ;;  %v1037_v9 = vld [vmem:[%s1963_s3 + $0x70] sm:$0xff]  ;;  %1404 = vmatprep.subr.mxu1 %v1627_v0 }
 0x170   : > { %1405 = vmatpush3.msra.mxu1 %v1037_v9 }
 0x171   : > { %1406 = vmatprep.subr.mxu1 %v1627_v0 }
 0x17c   : > { %v1504_v10 = vpop.eup %1503 }
 0x17d   : > { %v425_v11 = vsel %vm418_vm2, %v1504_v10, 0.0 }
 0x17e   : > { %426 = vadd.xlane.f32.xlu0 %v425_v11  ;;  %v1035_v11 = vld [vmem:[%s1963_s3 + $0x60] sm:$0xff] }
 0x207   : > { %v427_v13 = vpop.xlane.xlu0 %426 }
 0x208   : > { %1505 = vrcp.f32 %v427_v13  ;;  %v1033_v13 = vld [vmem:[%s1963_s3 + $0x50] sm:$0xff] }
 0x215   : > { %v1506_v15 = vpop.eup %1505 }
 0x216   : > { %v429_v16 = vmul.f32 %v1506_v15, %v1504_v10  ;;  %v1036_v10 = vld [vmem:[%s1963_s3 + $0x68] sm:$0xff]  ;;  %v1031_v15 = vld [vmem:[%s1963_s3 + $0x40] sm:$0xff] }
 0x217   : > { %1407 = vmatpush3.msra.mxu1 %v1036_v10 }
 0x218   : > { %1370 = vmatmul.mubr.msk.f32.vlgmr.msra.gmra.mxu0 %vm418_vm2, %v429_v16  ;;  %v503_v33 = vmul.f32 0.25, %v429_v16  ;;  %1408 = vmatprep.subr.mxu1 %v1627_v0  ;;  %v1030_v16 = vld [vmem:[%s1963_s3 + $0x38] sm:$0xff] }
 0x219   : > { %1373 = vmatpush3.xpose.msk.msra.mxu0 %vm341_vm1, %v507_v14  ;;  %1374 = vmatprep.mubr.msk.f32.mxu0 %vm1628_vm0, %v1627_v0  ;;  %v1032_v14 = vld [vmem:[%s1963_s3 + $0x48] sm:$0xff] }
 0x21a   : > { %1377 = vmatprep.subr.mxu0 %v1627_v0  ;;  %1409 = vmatpush3.msra.mxu1 %v1035_v11 }
 0x21b   : > { %1410 = vmatprep.subr.mxu1 %v1627_v0 }
 0x21c   : > { %1375 = vmatmul.mubr.msk.f32.vlgmr.msra.gmra.mxu0 %vm341_vm1, %v505_v17  ;;  %v1029_v17 = vld [vmem:[%s1963_s3 + $0x30] sm:$0xff] }
 0x21d   : > { %1379 = vmatprep.mubr.msk.f32.mxu0 %vm1628_vm0, %v1627_v0 }
 0x2d8   : > { %v1770_v18 = vpop.f32.mrf.mxu0 }
 0x2da   : > { %v1371_v19 = vpop.f32.mrf.mxu0 }
 0x2db   : > { %v1028_v19 = vld [vmem:[%s1963_s3 + $0x28] sm:$0xff] }
 0x2dc   : > { %v578_v20 = vpop.f32.mrf.mxu0 }
 0x2dd   : > { %v582_v21 = vsel %vm418_vm2, %v578_v20, -inf }
 0x2de   : > { %583 = vmax.xlane.f32.xlu0 %v582_v21  ;;  %v1376_v22 = vpop.f32.mrf.mxu0  ;;  %v1026_v21 = vld [vmem:[%s1963_s3 + $0x18] sm:$0xff] }
 0x2df   : > { %v1025_v22 = vld [vmem:[%s1963_s3 + $0x10] sm:$0xff] }
 0x2f4   : > { %594 = vrot.lane.b32.xlu0 %v1758_v12, %s1629_s19 }
 0x2f8   : > { %674 = vrot.lane.b32.xlu0 %v1738_v1, %s1630_s30 }
 0x2fc   : > { %672 = vrot.lane.b32.xlu0 %v1742_v3, %s1630_s30 }
 0x367   : > { %v584_v23 = vpop.xlane.xlu0 %583 }
 0x368   : > { %v585_v24 = vsub.f32 %v578_v20, %v584_v23  ;;  %v1027_v20 = vld [vmem:[%s1963_s3 + $0x20] sm:$0xff]  ;;  %v1024_v23 = vld [vmem:[%s1963_s3 + $0x8] sm:$0xff] }
 0x36a   : > { %v586_v25 = vmul.f32 1.442695, %v585_v24  ;;  %v1023_v24 = vld [vmem:[%s1963_s3] sm:$0xff] }
 0x36b   : > { %v595_v28 = vpop.permute.xlu0 %594 }
 0x36c   : > { %1507 = vpow2.f32 %v586_v25  ;;  %1378 = vmatpush3.msra.mxu0 %v595_v28 }
 0x36d   : > { %1382 = vmatprep.subr.mxu0 %v1627_v0 }
 0x36f   : > { %v675_v30 = vpop.permute.xlu0 %674 }
 0x373   : > { %v673_v35 = vpop.permute.xlu0 %672 }
 0x379   : > { %v1508_v26 = vpop.eup %1507 }
 0x37a   : > { %v588_v27 = vsel %vm418_vm2, %v1508_v26, 0.0 }
 0x37b   : > { %589 = vadd.xlane.f32.xlu1 %v588_v27 }
 0x38c   : > { %761 = vrot.lane.b32.xlu1 %v1758_v12, %s1630_s30 }
 0x390   : > { %841 = vrot.lane.b32.xlu1 %v1738_v1, %s1631_s8 }
 0x404   : > { %v590_v29 = vpop.xlane.xlu1 %589 }
 0x405   : > { %1509 = vrcp.f32 %v590_v29 }
 0x408   : > { %v762_v42 = vpop.permute.xlu1 %761 }
 0x40c   : > { %v842_v48 = vpop.permute.xlu1 %841 }
 0x412   : > { %v1510_v31 = vpop.eup %1509 }
 0x413   : > { %v592_v32 = vmul.f32 %v1510_v31, %v1508_v26 }
 0x415   : > { %1380 = vmatmul.mubr.msk.f32.vlgmr.msra.gmra.mxu0 %vm418_vm2, %v592_v32  ;;  %v670_v34 = vmul.f32 0.25, %v592_v32 }
 0x416   : > { %1383 = vmatpush3.xpose.msk.msra.mxu0 %vm341_vm1, %v675_v30  ;;  %1384 = vmatprep.mubr.msk.f32.mxu0 %vm1628_vm0, %v1627_v0 }
 0x417   : > { %1387 = vmatprep.subr.mxu0 %v1627_v0  ;;  %v671_v36 = vadd.f32 %v670_v34, %v503_v33 }
 0x419   : > { %1385 = vmatmul.mubr.msk.f32.vlgmr.msra.gmra.mxu0 %vm341_vm1, %v673_v35 }
 0x41a   : > { %1389 = vmatprep.mubr.msk.f32.mxu0 %vm1628_vm0, %v1627_v0  ;;  %1388 = vmatpush3.msra.mxu0 %v762_v42 }
 0x41b   : > { %1392 = vmatprep.subr.mxu0 %v1627_v0 }
 0x4d5   : > { %v666_v37 = vpop.f32.mrf.mxu0 }
 0x4d7   : > { %v1381_v38 = vpop.f32.mrf.mxu0 }
 0x4d9   : > { %v746_v39 = vpop.f32.mrf.mxu0 }
 0x4da   : > { %v750_v40 = vsel %vm418_vm2, %v746_v39, -inf }
 0x4db   : > { %751 = vmax.xlane.f32.xlu0 %v750_v40  ;;  %v1386_v41 = vpop.f32.mrf.mxu0 }
 0x564   : > { %v752_v43 = vpop.xlane.xlu0 %751 }
 0x565   : > { %v753_v44 = vsub.f32 %v746_v39, %v752_v43 }
 0x567   : > { %v754_v45 = vmul.f32 1.442695, %v753_v44 }
 0x569   : > { %1511 = vpow2.f32 %v754_v45 }
 0x576   : > { %v1512_v46 = vpop.eup %1511 }
 0x577   : > { %v756_v47 = vsel %vm418_vm2, %v1512_v46, 0.0 }
 0x578   : > { %757 = vadd.xlane.f32.xlu1 %v756_v47 }
 0x589   : > { %839 = vrot.lane.b32.xlu1 %v1742_v3, %s1631_s8 }
 0x601   : > { %v758_v49 = vpop.xlane.xlu1 %757 }
 0x602   : > { %1513 = vrcp.f32 %v758_v49 }
 0x605   : > { %v840_v53 = vpop.permute.xlu1 %839 }
 0x60f   : > { %v1514_v50 = vpop.eup %1513 }
 0x610   : > { %v760_v51 = vmul.f32 %v1514_v50, %v1512_v46 }
 0x612   : > { %1390 = vmatmul.mubr.msk.f32.vlgmr.msra.gmra.mxu0 %vm418_vm2, %v760_v51  ;;  %v837_v52 = vmul.f32 0.25, %v760_v51 }
 0x613   : > { %1393 = vmatpush3.xpose.msk.msra.mxu0 %vm341_vm1, %v842_v48  ;;  %1394 = vmatprep.mubr.msk.f32.mxu0 %vm1628_vm0, %v1627_v0 }
 0x614   : > { %1397 = vmatprep.subr.mxu0 %v1627_v0  ;;  %v838_v54 = vadd.f32 %v837_v52, %v671_v36 }
 0x616   : > { %1395 = vmatmul.mubr.msk.f32.vlgmr.msra.gmra.mxu0 %vm341_vm1, %v840_v53 }
 0x617   : > { %1399 = vmatprep.mubr.msk.f32.mxu0 %vm1628_vm0, %v1627_v0 }
 0x6d2   : > { %v833_v55 = vpop.f32.mrf.mxu0 }
 0x6d4   : > { %v1391_v56 = vpop.f32.mrf.mxu0 }
 0x6d6   : > { %v913_v57 = vpop.f32.mrf.mxu0 }
 0x6d7   : > { %v917_v58 = vsel %vm418_vm2, %v913_v57, -inf }
 0x6d8   : > { %918 = vmax.xlane.f32.xlu0 %v917_v58  ;;  %v1396_v59 = vpop.f32.mrf.mxu0 }
 0x6ee   : > { %928 = vrot.lane.b32.xlu0 %v1758_v12, %s1631_s8  ;;  %v1034_v12 = vld [vmem:[%s1963_s3 + $0x58] sm:$0xff] }
 0x6ef   : > { %1411 = vmatpush3.msra.mxu1 %v1034_v12 }
 0x6f0   : > { %1412 = vmatprep.subr.mxu1 %v1627_v0 }
 0x6f1   : > { %1413 = vmatpush3.msra.mxu1 %v1033_v13 }
 0x6f2   : > { %1007 = vrot.lane.b32.xlu0 %v666_v37, %s1631_s8  ;;  %1414 = vmatprep.subr.mxu1 %v1627_v0 }
 0x6f3   : > { %1415 = vmatpush3.msra.mxu1 %v1032_v14 }
 0x6f4   : > { %1416 = vmatprep.subr.mxu1 %v1627_v0 }
 0x6f5   : > { %1417 = vmatpush3.msra.mxu1 %v1031_v15 }
 0x6f6   : > { %1011 = vrot.lane.b32.xlu0 %v833_v55, %s1630_s30  ;;  %1418 = vmatprep.subr.mxu1 %v1627_v0  ;;  %s1632_s30 = smov [#allocation4]  }
 0x6f7   : > { %1419 = vmatpush3.msra.mxu1 %v1030_v16  ;;  %s1523_s8 = sshll.u32 %s1632_s30, 4  ;;  %s1524_s8 = int_to_ptr.vmem [resolvable:$false] %s1523_s8 }
 0x6f8   : > { %1420 = vmatprep.subr.mxu1 %v1627_v0  ;;  %s1525_s14 = scalar_lea.vmem %s1524_s8, 256 }
 0x6f9   : > { %1421 = vmatpush3.msra.mxu1 %v1029_v17 }
 0x6fa   : > { %1422 = vmatprep.subr.mxu1 %v1627_v0 }
 0x6fb   : > { %1423 = vmatpush3.msra.mxu1 %v1028_v19 }
 0x6fc   : > { %1424 = vmatprep.subr.mxu1 %v1627_v0 }
 0x6fd   : > { %1425 = vmatpush3.msra.mxu1 %v1027_v20 }
 0x6fe   : > { %1426 = vmatprep.subr.mxu1 %v1627_v0 }
 0x6ff   : > { %1427 = vmatpush3.msra.mxu1 %v1026_v21 }
 0x700   : > { %1428 = vmatprep.subr.mxu1 %v1627_v0 }
 0x701   : > { %1429 = vmatpush3.msra.mxu1 %v1025_v22 }
 0x702   : > { %1430 = vmatprep.subr.mxu1 %v1627_v0 }
 0x703   : > { %1431 = vmatpush3.msra.mxu1 %v1024_v23 }
 0x704   : > { %1432 = vmatprep.subr.mxu1 %v1627_v0 }
 0x705   : > { %1433 = vmatpush3.msra.mxu1 %v1023_v24 }
 0x761   : > { %v919_v60 = vpop.xlane.xlu0 %918 }
 0x762   : > { %v920_v61 = vsub.f32 %v913_v57, %v919_v60 }
 0x764   : > { %v921_v62 = vmul.f32 1.442695, %v920_v61 }
 0x765   : > { %v929_v63 = vpop.permute.xlu0 %928 }
 0x766   : > { %1515 = vpow2.f32 %v921_v62  ;;  %1398 = vmatpush3.msra.mxu0 %v929_v63 }
 0x769   : > { %v1008_v27 = vpop.permute.xlu0 %1007 }
 0x76a   : > { %v1018_v0 = vsel %vm341_vm1, %v1770_v18, %v1008_v27 }
 0x76d   : > { %v1012_v28 = vpop.permute.xlu0 %1011 }
 0x76e   : > { %v1020_v29 = vsel %vm1019_vm3, %v1018_v0, %v1012_v28 }
 0x773   : > { %v1516_v1 = vpop.eup %1515 }
 0x774   : > { %v923_v2 = vsel %vm418_vm2, %v1516_v1, 0.0 }
 0x775   : > { %924 = vadd.xlane.f32.xlu1 %v923_v2 }
 0x7fe   : > { %v925_v3 = vpop.xlane.xlu1 %924 }
 0x7ff   : > { %1517 = vrcp.f32 %v925_v3 }
 0x80c   : > { %v1518_v4 = vpop.eup %1517 }
 0x80d   : > { %v927_v5 = vmul.f32 %v1518_v4, %v1516_v1 }
 0x80f   : > { %1400 = vmatmul.mubr.msk.f32.vlgmr.msra.gmra.mxu0 %vm418_vm2, %v927_v5  ;;  %v1004_v6 = vmul.f32 0.25, %v927_v5 }
 0x811   : > { %v1005_v7 = vadd.f32 %v1004_v6, %v838_v54 }
 0x813   : > { %1117 = vst.msk [vmem:[%s1819_s13] sm:$0xff] %vm418_vm2, %v1005_v7 }
 0x8cf   : > { %v1000_v25 = vpop.f32.mrf.mxu0 }
 0x8d0   : > { %1015 = vrot.lane.b32.xlu0 %v1000_v25, %s1629_s19  ;;  %s1152_s19 = sshll.u32 %s1819_s13, 4  ;;  %s1153_s19 = int_to_ptr.vmem [resolvable:$true] %s1152_s19 }
 0x8d1   : > { %v1401_v26 = vpop.f32.mrf.mxu0  ;;  %s1519_s28 = scalar_lea.vmem %s1153_s19, 128  ;;  %p1526_p1 = scmp.lt.s32.totalorder %s1153_s19, %s1524_s8 }
 0x8d2   : > { %p1520_p12 = scmp.ne.s32.totalorder %s1153_s19, %s1519_s28  ;;  %p1527_p2 = scmp.lt.s32.totalorder %s1525_s14, %s1519_s28 }
 0x8d4   : > { %p1521_p13 = pnand %p1520_p12, %p1709_p4  ;;  %p1528_p3 = por %p1527_p2, %p1526_p1 }
 0x8d6   : > { %p1522_p0 = pneg %p1521_p13 }
 0x8d8   : > { %p1529_p5 = pnand %p1528_p3, %p1522_p0 }
 0x942   : > { %v1016_v30 = vpop.permute.xlu0 %1015 }
 0x943   : > { %v1022_v31 = vsel %vm1021_vm4, %v1020_v29, %v1016_v30 }
 0x944   : > { %1435 = vmatmul.mubr.f32.vlgmr.msra.gmra.mxu1 %v1022_v31 }
 0x945   : > { %1532 = shalt.err (!%p1529_p5)
}
 0x946   : > { %s1533_s15 = scalar_lea.hbm %s1150_s20, 128  ;;  %s1537_s18 = scalar_lea.hbm %s1966_s6, 256 }
 0x947   : > { %p1534_p6 = scmp.ne.s32.totalorder %s1150_s20, %s1533_s15  ;;  %p1538_p10 = scmp.lt.s32.totalorder %s1150_s20, %s1966_s6 }
 0x948   : > { %p1539_p11 = scmp.lt.s32.totalorder %s1537_s18, %s1533_s15 }
 0x949   : > { %p1535_p7 = pnand %p1534_p6, %p1709_p4 }
 0x94a   : > { %p1540_p12 = por %p1539_p11, %p1538_p10 }
 0x94b   : > { %p1536_p9 = pneg %p1535_p7 }
 0x94d   : > { %p1541_p13 = pnand %p1540_p12, %p1536_p9 }
 0x94f   : > { %1544 = shalt.err (!%p1541_p13)
}
 0x950   : > { %1439 = dma.vmem_to_hbm [thread:$0]  (%p1709_p4), %s1153_s19, 128, %s1150_s20, %s1124_s27   ;;  %v1322_v18 = vld [vmem:[%s1964_s4] ss:$0 sm:$0xff] }
 0x951   : > { %s1971_s8 = sshll.u32 %s1813_s11, 3  ;;  %s1972_s12 = sshll.u32 %s1617_s24, 7 }
 0x952   : > { %s308_s14 = scalar_lea.vmem [#allocation2], %s1971_s8  ;;  %s1919_s17 = scalar_lea.hbm %s1965_s5, %s1972_s12 }
 0x953   : > { %s1138_s13 = sshll.u32 %s308_s14, 4  ;;  %s1119_s18 = scalar_lea.sflag [#allocation3], %s1813_s11  ;;  %s1139_s13 = int_to_ptr.vmem [resolvable:$true] %s1138_s13 }
 0x954   : > { %s1545_s20 = scalar_lea.vmem %s1139_s13, 128  ;;  %s1633_s19 = smov [#allocation2]  }
 0x955   : > { %p1546_p0 = scmp.ne.s32.totalorder %s1139_s13, %s1545_s20  ;;  %s1549_s27 = sshll.u32 %s1633_s19, 4  ;;  %s1550_s27 = int_to_ptr.vmem [resolvable:$false] %s1549_s27 }
 0x956   : > { %s1551_s28 = scalar_lea.vmem %s1550_s27, 256  ;;  %p1552_p3 = scmp.lt.s32.totalorder %s1139_s13, %s1550_s27 }
 0x957   : > { %p1547_p1 = pnand %p1546_p0, %p1709_p4  ;;  %p1553_p5 = scmp.lt.s32.totalorder %s1551_s28, %s1545_s20 }
 0x959   : > { %p1548_p2 = pneg %p1547_p1  ;;  %p1554_p6 = por %p1553_p5, %p1552_p3 }
 0x95b   : > { %p1555_p7 = pnand %p1554_p6, %p1548_p2 }
 0xa04   : > { %v1112_v32 = vpop.f32.mrf.mxu1 }
 0xa05   : > { %v1113_v33 = vadd.f32 %v1322_v18, %v1112_v32 }
 0xa06   : > { %v1436_v34 = vpop.f32.mrf.mxu1 }
 0xa07   : > { %1116 = vst [vmem:[%s308_s14] sm:$0xff] %v1113_v33 }
 0xa08   : > { %1558 = shalt.err (!%p1555_p7)
}
 0xa09   : > { %s1559_s24 = scalar_lea.hbm %s1919_s17, 128  ;;  %s1563_s8 = scalar_lea.hbm %s1965_s5, 256 }
 0xa0a   : > { %p1560_p9 = scmp.ne.s32.totalorder %s1919_s17, %s1559_s24  ;;  %p1564_p12 = scmp.lt.s32.totalorder %s1919_s17, %s1965_s5 }
 0xa0b   : > { %p1565_p13 = scmp.lt.s32.totalorder %s1563_s8, %s1559_s24 }
 0xa0c   : > { %p1561_p10 = pnand %p1560_p9, %p1709_p4 }
 0xa0d   : > { %p1566_p0 = por %p1565_p13, %p1564_p12 }
 0xa0e   : > { %p1562_p11 = pneg %p1561_p10 }
 0xa10   : > { %p1567_p1 = pnand %p1566_p0, %p1562_p11 }
 0xa12   : > { %1570 = shalt.err (!%p1567_p1)
}
 0xa13   : > { %1438 = dma.vmem_to_hbm [thread:$0]  (%p1709_p4), %s1139_s13, 128, %s1919_s17, %s1119_s18  }
 0xa14 PF: > { %p1449_p2 = scmp.ge.s32.totalorder %s1625_s26, 2  ;;  %s1164_s16 = sand.u32 1, %s1605_s21  }
 0xa15   : > { %s1165_s15 = scalar_lea.sflag [#allocation3], %s1164_s16 }
 0xa16   : > { %p1443_p3 = pnand %p1449_p2, %p1716_p8 }
 0xa18   : > { %p1444_p5 = pneg %p1443_p3 }
 0xa1a   : > { %1596 = dma.done.wait (%p1444_p5), %s1165_s15, 128  }
 0xa1b   : > { %1598 = vsyncadd (%p1444_p5), %s1165_s15, 4294967168  ;;  %s1174_s20 = scalar_lea.sflag [#allocation5], %s1164_s16 }
 0xa1c   : > { %1600 = dma.done.wait (%p1444_p5), %s1174_s20, 128  }
 0xa1d   : > { %1602 = vsyncadd (%p1444_p5), %s1174_s20, 4294967168  ;;  %s23_s26 = sadd.s32 1, %s1625_s26   ;;  %s1973_s21 = smov %s1609_s22 }
 0xa1e   : > { %p20_p6 = scmp.ge.s32.totalorder %s23_s26, 4   ;;  %s1974_s22 = smov %s1613_s23 }
 0xa1f   : > { %s1975_s23 = smov %s1722_s10  ;;  %s1976_s24 = smov %s1621_s25 }
 0xa20   : > { %s1977_s25 = smov %s1979_s29  ;;  %22 = sbr.rel (!%p20_p6) target bundleno = 6 (0x6), region = 98 }
 0xa25   :  { %1179 = vsyncpa [#allocation3], 1 }
 0xa26   :  { %1181 = vsyncpa [#allocation3 + $0x1], 1 }
 0xa27   :  { %1182 = vsyncpa [#allocation5], 1 }
 0xa28   :  { %1184 = vsyncpa [#allocation5 + $0x1], 1 }

</bundles_post_ra>
